<compile_context>
chip_gen: v5e
topology: v5e:2x2
jax: 0.10.0
libtpu: 0.0.40
codegen_flags: <defaults>
</compile_context>

<pallas_src>
import math

import jax
import jax.numpy as jnp
from jax.experimental import pallas as pl
from jax.experimental.pallas import tpu as pltpu


def _cdiv(a, b):
    return -(-a // b)


def _make_concat_kernel(num_inputs, seg_starts, seg_sizes, crops, th, tw):
    """Kernel body for K branches.

    refs = (x_0, ..., x_{K-1}, out).  Grid = (batch, S) where S enumerates the
    channel blocks of the concatenated output; branch j owns the segment
    [seg_starts[j], seg_starts[j] + seg_sizes[j]) of the s-axis.  Each step
    center-crops its branch's uncropped VMEM tile and writes the (.., th, tw)
    result directly into the output tile (pure copy, no accumulation).
    """

    def kernel(*refs):
        in_refs = refs[:num_inputs]
        o_ref = refs[num_inputs]
        s = pl.program_id(1)
        for j in range(num_inputs):
            lo = seg_starts[j]
            hi = lo + seg_sizes[j]
            d2, d3 = crops[j]

            @pl.when(jnp.logical_and(s >= lo, s < hi))
            def _(j=j, d2=d2, d3=d3):
                # static center-crop slice fused into the copy
                o_ref[...] = in_refs[j][:, :, d2:d2 + th, d3:d3 + tw]

    return kernel


def concat_forward(inputs, dim=1):
    """Pallas equivalent of Concat.forward given the branch outputs `inputs`."""
    assert len(inputs) >= 1
    ndim = inputs[0].ndim
    assert ndim == 4, "Concat (NAS-DIP) operates on NCHW tensors"
    dim = dim % ndim
    # TODO(synk): only the NAS-DIP channel concat (dim=1) is implemented; other
    # dims would need a different (lane-dense) output layout.
    assert dim == 1, "this Pallas kernel implements the NAS-DIP case dim=1"

    dtype = inputs[0].dtype
    N = inputs[0].shape[0]
    for x in inputs:
        assert x.ndim == 4
        assert x.dtype == dtype, "torch.cat requires a single dtype"
        assert x.shape[0] == N

    Cs = [x.shape[1] for x in inputs]
    Hs = [x.shape[2] for x in inputs]
    Ws = [x.shape[3] for x in inputs]
    th, tw = min(Hs), min(Ws)
    crops = [((H - th) // 2, (W - tw) // 2) for H, W in zip(Hs, Ws)]
    sumC = sum(Cs)

    itemsize = jnp.dtype(dtype).itemsize
    sub = 8 * max(1, 4 // itemsize)  # sublane multiple: 8 f32 / 16 bf16 / 32 i8

    def padded_plane_bytes(H, W):
        # conservative VMEM footprint of one (H, W) channel plane
        return (_cdiv(H, sub) * sub) * (_cdiv(W, 128) * 128) * itemsize

    # Channel block size must divide every C_i (then every concat offset is a
    # whole number of blocks, so the output index_map stays a pure block index).
    g = 0
    for C in Cs:
        g = math.gcd(g, C)
    per_chan = 2 * (sum(padded_plane_bytes(H, W) for H, W in zip(Hs, Ws))
                    + padded_plane_bytes(th, tw))  # double-buffered, all refs
    budget = 12 * 1024 * 1024
    divisors = sorted((d for d in range(1, g + 1) if g % d == 0), reverse=True)
    c_blk = 1
    for d in divisors:
        if d * per_chan <= budget:
            c_blk = d
            break

    def total_steps(cb):
        return N * sum(C // cb for C in Cs)

    # keep >=2 grid steps so the pipeline overlaps and megacore can shard
    if total_steps(c_blk) < 2:
        smaller = [d for d in divisors if d < c_blk]
        if smaller:
            c_blk = smaller[0]

    nblks = [C // c_blk for C in Cs]
    seg_starts = []
    acc = 0
    for nb in nblks:
        seg_starts.append(acc)
        acc += nb
    S = acc  # total output channel blocks

    kernel = _make_concat_kernel(len(inputs), seg_starts, nblks, crops, th, tw)

    def make_in_map(start, nblk):
        def index_map(n, s):
            # Clamp into this branch's own channel blocks; outside its segment
            # the index is frozen, so no redundant DMA is issued.
            c = jnp.minimum(jnp.maximum(s - start, 0), nblk - 1)
            return (n, c, 0, 0)
        return index_map

    in_specs = [
        pl.BlockSpec((1, c_blk, H, W), make_in_map(st, nb))
        for H, W, st, nb in zip(Hs, Ws, seg_starts, nblks)
    ]
    out_specs = pl.BlockSpec((1, c_blk, th, tw), lambda n, s: (n, s, 0, 0))

    bytes_accessed = (sum(int(x.size) for x in inputs)
                      + N * sumC * th * tw) * itemsize

    out = pl.pallas_call(
        kernel,
        out_shape=jax.ShapeDtypeStruct((N, sumC, th, tw), dtype),
        grid_spec=pl.GridSpec(grid=(N, S), in_specs=in_specs,
                              out_specs=out_specs),
        compiler_params=pltpu.CompilerParams(
            dimension_semantics=("parallel", "parallel"),
            vmem_limit_bytes=32 * 1024 * 1024,
        ),
        cost_estimate=pl.CostEstimate(
            flops=0, transcendentals=0, bytes_accessed=bytes_accessed),
    )(*inputs)
    return out


def _reference(inputs, dim=1):
    Hs = [x.shape[2] for x in inputs]
    Ws = [x.shape[3] for x in inputs]
    th, tw = min(Hs), min(Ws)
    cropped = []
    for x in inputs:
        d2 = (x.shape[2] - th) // 2
        d3 = (x.shape[3] - tw) // 2
        cropped.append(x[:, :, d2:d2 + th, d3:d3 + tw])
    return jnp.concatenate(cropped, axis=dim)


if __name__ == "__main__":
    key = jax.random.PRNGKey(0)
    k1, k2 = jax.random.split(key)

    # Two "branch" outputs with mismatched spatial sizes to exercise the
    # fused center-crop path (typical NAS-DIP skip/upsample branch mismatch).
    x1 = jax.random.normal(k1, (2, 4, 16, 16), dtype=jnp.float32)
    x2 = jax.random.normal(k2, (2, 8, 18, 18), dtype=jnp.float32)

    out = concat_forward([x1, x2], dim=1)
    jax.block_until_ready(out)

    ref = _reference([x1, x2], dim=1)
    assert out.shape == (2, 12, 16, 16), out.shape
    assert out.dtype == x1.dtype
    assert bool(jnp.array_equal(out, ref))

    print("KERNEL_OK")
</pallas_src>

<mosaic_0001>
module attributes {stable_mosaic.version = 11 : i64} {
  func.func @kernel(%arg0: i32, %arg1: i32, %arg2: memref<1x4x16x16xf32, #tpu.memory_space<vmem>>, %arg3: memref<1x4x18x18xf32, #tpu.memory_space<vmem>>, %arg4: memref<1x4x16x16xf32, #tpu.memory_space<vmem>>) attributes {dimension_semantics = [#tpu.dimension_semantics<parallel>, #tpu.dimension_semantics<parallel>], iteration_bounds = array<i64: 2, 3>, scalar_prefetch = 0 : i64, scratch_operands = 0 : i64, tpu.core_type = #tpu.core_type<tc>, window_params = [{transform_indices = @transform_0, window_bounds = array<i64: 1, 4, 16, 16>}, {transform_indices = @transform_1, window_bounds = array<i64: 1, 4, 18, 18>}, {transform_indices = @transform_2, window_bounds = array<i64: 1, 4, 16, 16>}]} {
    %c0_i32 = arith.constant 0 : i32
    %0 = arith.cmpi sge, %arg1, %c0_i32 : i32
    %c1_i32 = arith.constant 1 : i32
    %1 = arith.cmpi slt, %arg1, %c1_i32 : i32
    %2 = arith.andi %0, %1 : i1
    %3 = arith.extui %2 : i1 to i32
    %c0_i32_0 = arith.constant 0 : i32
    %4 = arith.cmpi ne, %3, %c0_i32_0 : i32
    scf.if %4 {
      %c0 = arith.constant 0 : index
      %c0_3 = arith.constant 0 : index
      %c0_4 = arith.constant 0 : index
      %c0_5 = arith.constant 0 : index
      %10 = vector.load %arg2[%c0, %c0_3, %c0_4, %c0_5] : memref<1x4x16x16xf32, #tpu.memory_space<vmem>>, vector<1x4x16x16xf32>
      %c0_6 = arith.constant 0 : index
      %c0_7 = arith.constant 0 : index
      %c0_8 = arith.constant 0 : index
      %c0_9 = arith.constant 0 : index
      %11 = vector.load %arg4[%c0_6, %c0_7, %c0_8, %c0_9] : memref<1x4x16x16xf32, #tpu.memory_space<vmem>>, vector<1x4x16x16xf32>
      tpu.vector_store %arg4[%c0_6, %c0_7, %c0_8, %c0_9], %10 {strides = array<i32>} : memref<1x4x16x16xf32, #tpu.memory_space<vmem>>, vector<1x4x16x16xf32>,
    } else {
    }
    %c1_i32_1 = arith.constant 1 : i32
    %5 = arith.cmpi sge, %arg1, %c1_i32_1 : i32
    %c3_i32 = arith.constant 3 : i32
    %6 = arith.cmpi slt, %arg1, %c3_i32 : i32
    %7 = arith.andi %5, %6 : i1
    %8 = arith.extui %7 : i1 to i32
    %c0_i32_2 = arith.constant 0 : i32
    %9 = arith.cmpi ne, %8, %c0_i32_2 : i32
    scf.if %9 {
      %c0 = arith.constant 0 : index
      %c0_3 = arith.constant 0 : index
      %c1 = arith.constant 1 : index
      %c1_4 = arith.constant 1 : index
      %10 = vector.load %arg3[%c0, %c0_3, %c1, %c1_4] : memref<1x4x18x18xf32, #tpu.memory_space<vmem>>, vector<1x4x16x16xf32>
      %c0_5 = arith.constant 0 : index
      %c0_6 = arith.constant 0 : index
      %c0_7 = arith.constant 0 : index
      %c0_8 = arith.constant 0 : index
      %11 = vector.load %arg4[%c0_5, %c0_6, %c0_7, %c0_8] : memref<1x4x16x16xf32, #tpu.memory_space<vmem>>, vector<1x4x16x16xf32>
      tpu.vector_store %arg4[%c0_5, %c0_6, %c0_7, %c0_8], %10 {strides = array<i32>} : memref<1x4x16x16xf32, #tpu.memory_space<vmem>>, vector<1x4x16x16xf32>,
    } else {
    }
    return
  }
  func.func @transform_0(%arg0: i32, %arg1: i32) -> (i32, i32, i32, i32) {
    %c0_i32 = arith.constant 0 : i32
    %0 = arith.subi %arg1, %c0_i32 : i32
    %c0_i32_0 = arith.constant 0 : i32
    %1 = arith.maxsi %0, %c0_i32_0 : i32
    %c0_i32_1 = arith.constant 0 : i32
    %2 = arith.minsi %1, %c0_i32_1 : i32
    %c0_i32_2 = arith.constant 0 : i32
    %c0_i32_3 = arith.constant 0 : i32
    %c0_i32_4 = arith.constant 0 : i32
    return %arg0, %2, %c0_i32_2, %c0_i32_3 : i32, i32, i32, i32
  }
  func.func @transform_1(%arg0: i32, %arg1: i32) -> (i32, i32, i32, i32) {
    %c1_i32 = arith.constant 1 : i32
    %0 = arith.subi %arg1, %c1_i32 : i32
    %c0_i32 = arith.constant 0 : i32
    %1 = arith.maxsi %0, %c0_i32 : i32
    %c1_i32_0 = arith.constant 1 : i32
    %2 = arith.minsi %1, %c1_i32_0 : i32
    %c0_i32_1 = arith.constant 0 : i32
    %c0_i32_2 = arith.constant 0 : i32
    %c0_i32_3 = arith.constant 0 : i32
    return %arg0, %2, %c0_i32_1, %c0_i32_2 : i32, i32, i32, i32
  }
  func.func @transform_2(%arg0: i32, %arg1: i32) -> (i32, i32, i32, i32) {
    %c0_i32 = arith.constant 0 : i32
    %c0_i32_0 = arith.constant 0 : i32
    %c0_i32_1 = arith.constant 0 : i32
    return %arg0, %arg1, %c0_i32, %c0_i32_0 : i32, i32, i32, i32
  }
}

</mosaic_0001>

<bundles_post_ra>
// kernel: tpu_custom_call.1
= control target key start
LH: loop header
LB: loop body
LE: loop exit
PB: predicated region body
PF: predicated region fallthrough
CT: control target
= control target key end

     0   :  { %7 = vsyncpa [#allocation3], 0  ;;  %s900_s0 = inlined_call_operand.vmem [shape: f32[2,4,16,16], index: 0, kind: input, shape index: {}]   ;;  %s901_s1 = inlined_call_operand.vmem [shape: f32[2,8,18,18], index: 1, kind: input, shape index: {}]   ;;  %s902_s2 = inlined_call_operand.hbm [shape: f32[2,12,16,16], index: 2, kind: output, shape index: {}]  }
   0x1   :  { %9 = vsyncpa [#allocation3 + $0x1], 0  ;;  %s731_s9 = smov 0   ;;  %s733_s10 = smov 0  }
   0x2   :  { %s735_s11 = smov 0   ;;  %s737_s12 = smov 0  }
   0x3   :  { %s739_s13 = smov 0   ;;  %s741_s14 = smov 0  }
   0x4   :  { %s743_s15 = smov 0   ;;  %s745_s16 = smov 0  }
   0x5 LB: > { %s481_s17 = sadd.s32 4294967295, %s711_s16   ;;  %s482_s18 = sadd.s32 4294967294, %s711_s16   ;;  %s711_s16 = sphi %s745_s16, %s15_s16   ;;  %s707_s15 = sphi %s743_s15, %s916_s15   ;;  %s703_s14 = sphi %s741_s14, %s915_s14   ;;  %s699_s13 = sphi %s739_s13, %s914_s13   ;;  %s695_s12 = sphi %s737_s12, %s913_s12   ;;  %s691_s11 = sphi %s735_s11, %s912_s11   ;;  %s687_s10 = sphi %s733_s10, %s911_s10   ;;  %s683_s9 = sphi %s731_s9, %s910_s9  }
   0x6   : > { %s24_s19 = sadd.s32 1, %s703_s14  ;;  %s27_s20 = sadd.s32 1, %s707_s15 }
   0x7   : > { %p25_p0 = scmp.ge.s32.totalorder %s24_s19, 3  ;;  %p120_p1 = scmp.ne.s32.totalorder %s691_s11, %s687_s10 }
   0x8   : > { %p121_p2 = scmp.eq.s32.totalorder %s481_s17, 5  ;;  %p126_p5 = scmp.ne.s32.totalorder %s687_s10, %s683_s9 }
   0x9   : > { %s918_s19 = smov (%p25_p0, %s24_s19), 0  ;;  %s920_s20 = smov (!%p25_p0, %s27_s20), %s707_s15 }
   0xa   : > { %s106_s21 = ssub.s32 %s703_s14, %s918_s19  ;;  %p782_p3 = por %p121_p2, %p120_p1 }
   0xb   : > { %p29_p4 = scmp.ge.s32.totalorder %s920_s20, 2  ;;  %p127_p6 = scmp.eq.s32.totalorder %s482_s18, 5 }
   0xc   : > { %p507_p7 = scmp.ge.s32.totalorder %s711_s16, 1  ;;  %p191_p9 = scmp.lt.s32.totalorder %s711_s16, 7 }
   0xd   : > { %s922_s20 = smov (%p29_p4, %s920_s20), 0  ;;  %p791_p8 = por %p127_p6, %p126_p5 }
   0xe   : > { %906 = sst [smem:[#allocation5_spill]] %s922_s20  ;;  %s105_s24 = ssub.s32 %s707_s15, %s922_s20 }
   0xf   : > { %s110_s25 = sadd.s32 1, %s691_s11  ;;  %s107_s26 = sor.u32 %s106_s21, %s105_s24 }
  0x10   : > { %p192_p10 = pnand %p507_p7, %p191_p9  ;;  %p108_p11 = scmp.eq.s32.totalorder %s107_s26, 0 }
  0x11   : > { %s903_s28 = sand.u32 (!%p192_p10), 1, %s687_s10   ;;  %p242_p12 = scmp.lt.s32.totalorder (!%p192_p10), %s699_s13, 1 }
  0x12   : > { %s800_s27 = scalar_select %p108_p11, %s691_s11, %s110_s25  }
  0x13   : > { %195 = sbr.rel (%p192_p10) target bundleno = 209 (0xd1), region = 28  ;;  %s508_s29 = sshll.u32 (!%p192_p10), %s903_s28, 6 }
  0x14   : > { %s518_s30 = sadd.s32 (!%p192_p10), 4294967295, %s695_s12  ;;  %p278_p1 = scmp.ge.s32.totalorder (!%p192_p10), %s695_s12, 0 }
  0x15   : > { %p257_p13 = scmp.gt.s32.totalorder (!%p192_p10), %s518_s30, 0  ;;  %p519_p0 = scmp.lt.s32.totalorder (!%p192_p10), %s518_s30, 1 }
  0x16   : > { %p279_p2 = scmp.lt.s32.totalorder (!%p192_p10), %s695_s12, 1 }
  0x18   : > { %s243_s3 = scalar_select %p242_p12, %s699_s13, 1 }
  0x19   : > { %s258_s4 = scalar_select %p257_p13, %s518_s30, 0 }
  0x1a   : > { %s536_s5 = sshll.u32 %s243_s3, 6  ;;  %p280_p5 = pnand %p279_p2, %p278_p1 }
  0x1b   : > { %s250_s8 = scalar_lea.vmem %s900_s0, %s536_s5  ;;  %s924_s4 = smov (!%p519_p0, %s258_s4), 1 }
  0x1c   : > { %s524_s17 = sshll.u32 %s924_s4, 2  ;;  %s541_s18 = smul.u32 24, %s243_s3 }
  0x1d   : > { %p264_p4 = scmp.lt.s32.totalorder %s524_s17, 7  ;;  %s818_s30 = scalar_lea.vmem [#allocation2], %s508_s29 }
  0x1f   : > { %s926_s17 = smov (!%p264_p4, %s524_s17), 7 }
  0x20   : > { %s540_s21 = smul.u32 3, %s926_s17 }
  0x21   : > { %283 = sbr.rel (%p280_p5) target bundleno = 47 (0x2f), region = 32 }
  0x22   : > { %s268_s24 = sadd.s32 %s541_s18, %s540_s21 }
  0x23   : > { %s525_s25 = sshll.u32 %s268_s24, 3 }
  0x24   : > { %s816_s20 = scalar_lea.vmem %s901_s1, %s525_s25 }
  0x26   : > { %v284_v0 = vld [vmem:[%s250_s8] sm:$0xff]  ;;  %vm292_vm0 = vcmask 130048   ;;  %v285_v1 = vld [vmem:[%s250_s8 + $0x8] sm:$0xff]  ;;  %v286_v2 = vld [vmem:[%s250_s8 + $0x10] sm:$0xff] }
  0x27   : > { %293 = vst.msk [vmem:[%s818_s30] sm:$0xff] %vm292_vm0, %v284_v0  ;;  %v287_v3 = vld [vmem:[%s250_s8 + $0x18] sm:$0xff]  ;;  %v288_v4 = vld [vmem:[%s250_s8 + $0x20] sm:$0xff]  ;;  %v289_v5 = vld [vmem:[%s250_s8 + $0x28] sm:$0xff] }
  0x28   : > { %294 = vst.msk [vmem:[%s818_s30 + $0x8] sm:$0xff] %vm292_vm0, %v285_v1  ;;  %v290_v6 = vld [vmem:[%s250_s8 + $0x30] sm:$0xff]  ;;  %v291_v7 = vld [vmem:[%s250_s8 + $0x38] sm:$0xff] }
  0x29   : > { %295 = vst.msk [vmem:[%s818_s30 + $0x10] sm:$0xff] %vm292_vm0, %v286_v2 }
  0x2a   : > { %296 = vst.msk [vmem:[%s818_s30 + $0x18] sm:$0xff] %vm292_vm0, %v287_v3 }
  0x2b   : > { %297 = vst.msk [vmem:[%s818_s30 + $0x20] sm:$0xff] %vm292_vm0, %v288_v4 }
  0x2c   : > { %298 = vst.msk [vmem:[%s818_s30 + $0x28] sm:$0xff] %vm292_vm0, %v289_v5 }
  0x2d   : > { %299 = vst.msk [vmem:[%s818_s30 + $0x30] sm:$0xff] %vm292_vm0, %v290_v6 }
  0x2e   : > { %300 = vst.msk [vmem:[%s818_s30 + $0x38] sm:$0xff] %vm292_vm0, %v291_v7 }
  0x2f PF: > { %p301_p6 = scmp.ge.s32.totalorder %s695_s12, 1  ;;  %p302_p7 = scmp.lt.s32.totalorder %s695_s12, 3 }
  0x31   : > { %p303_p9 = pnand %p302_p7, %p301_p6 }
  0x32   : > { %s713_s28 = smov (!%p303_p9), 127  }
  0x33   : > { %306 = sbr.rel (%p303_p9) target bundleno = 190 (0xbe), region = 36 }
  0x38   : > { %v309_v8 = vld [vmem:[%s816_s20 + $0x19] sm:$0xff]  ;;  %v307_v9 = vld [vmem:[%s816_s20 + $0x1] sm:$0xff]  ;;  %v311_v10 = vld [vmem:[%s816_s20 + $0x31] sm:$0xff]  ;;  %vm347_vm1 = vcmask 130048  }
  0x39   : > { %327 = vrot.lane.b32.xlu1 %v309_v8, %s713_s28  ;;  %323 = vrot.lane.b32.xlu0 %v307_v9, %s713_s28  ;;  %v310_v11 = vld [vmem:[%s816_s20 + $0x21] sm:$0xff]  ;;  %v308_v12 = vld [vmem:[%s816_s20 + $0x9] sm:$0xff] }
  0x3a   : > { %331 = vrot.lane.b32.xlu2 %v311_v10, %s713_s28  ;;  %v312_v13 = vld [vmem:[%s816_s20 + $0x39] sm:$0xff]  ;;  %v314_v14 = vld [vmem:[%s816_s20 + $0x51] sm:$0xff]  ;;  %v313_v15 = vld [vmem:[%s816_s20 + $0x49] sm:$0xff] }
  0x41   : > { %329 = vrot.lane.b32.xlu1 %v310_v11, %s713_s28  ;;  %325 = vrot.lane.b32.xlu0 %v308_v12, %s713_s28 }
  0x42   : > { %333 = vrot.lane.b32.xlu2 %v312_v13, %s713_s28 }
  0x49   : > { %337 = vrot.lane.b32.xlu1 %v314_v14, %s713_s28  ;;  %335 = vrot.lane.b32.xlu0 %v313_v15, %s713_s28 }
  0x94   : > { %v332_v16 = vpop.permute.xlu2 %331 }
  0x95   : > { %352 = vst.msk [vmem:[%s818_s30 + $0x20] sm:$0xff] %vm347_vm1, %v332_v16 }
  0x9c   : > { %v334_v17 = vpop.permute.xlu2 %333 }
  0x9d   : > { %353 = vst.msk [vmem:[%s818_s30 + $0x28] sm:$0xff] %vm347_vm1, %v334_v17 }
  0xab   : > { %v328_v18 = vpop.permute.xlu1 %327  ;;  %v324_v19 = vpop.permute.xlu0 %323 }
  0xac   : > { %350 = vst.msk [vmem:[%s818_s30 + $0x10] sm:$0xff] %vm347_vm1, %v328_v18 }
  0xad   : > { %348 = vst.msk [vmem:[%s818_s30] sm:$0xff] %vm347_vm1, %v324_v19 }
  0xb3   : > { %v330_v20 = vpop.permute.xlu1 %329  ;;  %v326_v21 = vpop.permute.xlu0 %325 }
  0xb4   : > { %351 = vst.msk [vmem:[%s818_s30 + $0x18] sm:$0xff] %vm347_vm1, %v330_v20 }
  0xb5   : > { %349 = vst.msk [vmem:[%s818_s30 + $0x8] sm:$0xff] %vm347_vm1, %v326_v21 }
  0xbb   : > { %v338_v22 = vpop.permute.xlu1 %337  ;;  %v336_v23 = vpop.permute.xlu0 %335 }
  0xbc   : > { %355 = vst.msk [vmem:[%s818_s30 + $0x38] sm:$0xff] %vm347_vm1, %v338_v22 }
  0xbd   : > { %354 = vst.msk [vmem:[%s818_s30 + $0x30] sm:$0xff] %vm347_vm1, %v336_v23 }
  0xbe PF: > { %s539_s20 = sshll.u32 %s695_s12, 3  ;;  %s542_s29 = smul.u32 24, %s699_s13 }
  0xbf   : > { %s372_s3 = sshll.u32 %s818_s30, 4  ;;  %s908_s18 = sand.u32 1, %s687_s10   ;;  %s373_s3 = int_to_ptr.vmem [resolvable:$true] %s372_s3 }
  0xc0   : > { %s369_s4 = sadd.s32 %s542_s29, %s539_s20  ;;  %s357_s21 = scalar_lea.sflag [#allocation3], %s908_s18 }
  0xc1   : > { %s529_s5 = sshll.u32 %s369_s4, 3  ;;  %s637_s26 = scalar_lea.hbm %s902_s2, 384 }
  0xc2   : > { %s371_s8 = scalar_lea.hbm %s902_s2, %s529_s5 }
  0xc3   : > { %s374_s17 = sshll.u32 %s371_s8, 4  ;;  %s375_s17 = int_to_ptr.hbm [resolvable:$true] %s374_s17 }
  0xc4   : > { %s631_s24 = sshra.s32 %s375_s17, 4  ;;  %s632_s24 = int_to_ptr.hbm [resolvable:$true] %s631_s24 }
  0xc5   : > { %s633_s25 = scalar_lea.hbm %s632_s24, 64  ;;  %p638_p13 = scmp.lt.s32.totalorder %s632_s24, %s902_s2 }
  0xc6   : > { %p634_p10 = scmp.ne.s32.totalorder %s632_s24, %s633_s25  ;;  %p639_p0 = scmp.lt.s32.totalorder %s637_s26, %s633_s25 }
  0xc8   : > { %p635_p11 = pnand %p634_p10, %p782_p3  ;;  %p640_p1 = por %p639_p0, %p638_p13 }
  0xca   : > { %p636_p12 = pneg %p635_p11 }
  0xcc   : > { %p641_p2 = pnand %p640_p1, %p636_p12 }
  0xce   : > { %644 = shalt.err (!%p641_p2)
}
  0xcf   : > { %s714_s20 = smov 128   ;;  %s715_s29 = smov 8  }
  0xd0   : > { %543 = dma.vmem_to_hbm [thread:$0]  (%p782_p3), %s373_s3, 1024, %s375_s17, %s357_s21, %s714_s20, %s714_s20, %s715_s29  }
  0xd1 PF: > { %p549_p4 = scmp.ge.s32.totalorder %s711_s16, 2  ;;  %s389_s4 = sand.u32 1, %s683_s9  }
  0xd2   : > { %s390_s5 = scalar_lea.sflag [#allocation3], %s389_s4 }
  0xd3   : > { %p546_p5 = pnand %p549_p4, %p791_p8 }
  0xd5   : > { %p547_p6 = pneg %p546_p5 }
  0xd7   : > { %678 = dma.done.wait (%p547_p6), %s390_s5, 1024  }
  0xd8   : > { %680 = vsyncadd (%p547_p6), %s390_s5, 4294966272  ;;  %s15_s16 = sadd.s32 1, %s711_s16   ;;  %s909_s22 = sld [smem:[#allocation5_spill]] }
  0xd9   : > { %p12_p7 = scmp.ge.s32.totalorder %s15_s16, 8   ;;  %s910_s9 = smov %s687_s10 }
  0xda   : > { %s911_s10 = smov %s691_s11  ;;  %s912_s11 = smov %s800_s27 }
  0xdb   : > { %s913_s12 = smov %s703_s14  ;;  %s914_s13 = smov %s707_s15 }
  0xdc   : > { %s915_s14 = smov %s918_s19  ;;  %14 = sbr.rel (!%p12_p7) target bundleno = 5 (0x5), region = 74 }
  0xde   : > { %s916_s15 = smov %s909_s22 }
  0xe1   :  { %396 = vsyncpa [#allocation3], 1 }
  0xe2   :  { %398 = vsyncpa [#allocation3 + $0x1], 1 }

</bundles_post_ra>
